<compile_context>
chip_gen: v7x
topology: tpu7x:2x2x1
jax: 0.10.0
libtpu: 0.0.40
codegen_flags: <defaults>
</compile_context>

<pallas_src>
import functools

import jax
import jax.numpy as jnp
from jax import lax
from jax.experimental import pallas as pl
from jax.experimental.pallas import tpu as pltpu

_LANE = 128
_SUB = 8                     # sublane granularity (f32)
_MAX_BLOCK_ROWS = 2048       # 1 MiB f32 per input per grid step
_FUSE_MAX_ROWS = 4096        # keys up to 2 MiB f32 get fused into one call


def _build_kernel(valid_rows, block_rows, blocks_per_core, segments):
    """Weighted-SSE kernel: acc += w_row * (x - y)^2, scalar reduce at end."""
    segments = tuple(segments)

    def kernel(x_ref, y_ref, o_ref, acc_ref):
        c = pl.program_id(0)   # per-core ("parallel") axis
        i = pl.program_id(1)   # reduction ("arbitrary") axis

        @pl.when(i == 0)
        def _init():
            acc_ref[...] = jnp.zeros_like(acc_ref)

        d = x_ref[...].astype(jnp.float32) - y_ref[...].astype(jnp.float32)
        sq = d * d

        # Global row index of every row in this (possibly clamped) block.
        row0 = (c * blocks_per_core + i) * block_rows
        row_ids = row0 + lax.broadcasted_iota(jnp.int32, (block_rows, 1), 0)

        # Per-row weight: 1/N_k inside key k's row range (static segments).
        w = jnp.zeros((block_rows, 1), jnp.float32)
        for start, stop, inv_n in segments:
            w = jnp.where((row_ids >= start) & (row_ids < stop),
                          jnp.float32(inv_n), w)

        # Rows at/past `valid_rows` correspond to out-of-bounds (garbage) data
        # of the ragged edge block or to a clamped duplicate block: select 0.
        acc_ref[...] += jnp.where(row_ids < valid_rows, w * sq, 0.0)

        @pl.when(i == pl.num_programs(1) - 1)
        def _finalize():
            o_ref[0, 0] = jnp.sum(acc_ref[...])

    return kernel


@functools.partial(jax.jit, static_argnames=("segments", "block_rows", "num_cores"))
def _weighted_sse_call(x2, y2, *, segments, block_rows, num_cores):
    rows = x2.shape[0]
    nb = -(-rows // block_rows)          # number of real row blocks
    bpc = -(-nb // num_cores)            # blocks per core (ceil)

    def in_map(c, i):
        # Clamp so phantom steps (when nb is not a multiple of num_cores)
        # re-read the last real block; the in-kernel row mask zeroes them.
        return (jnp.minimum(c * bpc + i, nb - 1), 0)

    kernel = _build_kernel(rows, block_rows, bpc, segments)

    partials = pl.pallas_call(
        kernel,
        out_shape=jax.ShapeDtypeStruct((num_cores, 1), jnp.float32),
        grid_spec=pltpu.PrefetchScalarGridSpec(
            num_scalar_prefetch=0,
            grid=(num_cores, bpc),
            in_specs=[
                pl.BlockSpec((block_rows, _LANE), in_map),
                pl.BlockSpec((block_rows, _LANE), in_map),
            ],
            out_specs=pl.BlockSpec(
                (1, 1), lambda c, i: (c, 0),
                memory_space=pltpu.MemorySpace.SMEM,
            ),
            scratch_shapes=[pltpu.VMEM((block_rows, _LANE), jnp.float32)],
        ),
        compiler_params=pltpu.CompilerParams(
            dimension_semantics=("parallel", "arbitrary"),
        ),
    )(x2, y2)
    return jnp.sum(partials)


def _prep_pair(x, y):
    """Flatten to (rows, 128) in the native (promoted) dtype. Returns
    (x2, y2, n_elems). Pads only to the next multiple of 1024 elements."""
    assert x.shape == y.shape, (x.shape, y.shape)
    n = int(x.size)
    dt = jnp.result_type(x.dtype, y.dtype)
    xf = jnp.ravel(x).astype(dt)
    yf = jnp.ravel(y).astype(dt)
    pad = (-n) % (_SUB * _LANE)
    if pad:  # TODO(synk): element-granular in-kernel tail mask would avoid this copy
        xf = jnp.pad(xf, (0, pad))
        yf = jnp.pad(yf, (0, pad))
    rows = (n + pad) // _LANE
    return xf.reshape(rows, _LANE), yf.reshape(rows, _LANE), n


def _grouped_mse(parts):
    """parts: tuple of (x2, y2, n_elems).  Returns sum_k mean((x_k-y_k)^2)
    computed by a single pallas_call."""
    if len(parts) == 1:
        x2, y2, _ = parts[0]
    else:
        dt = jnp.result_type(*(p[0].dtype for p in parts),
                             *(p[1].dtype for p in parts))
        x2 = jnp.concatenate([p[0].astype(dt) for p in parts], axis=0)
        y2 = jnp.concatenate([p[1].astype(dt) for p in parts], axis=0)

    segments, off = [], 0
    for xp, _, n in parts:
        r = xp.shape[0]
        segments.append((off, off + r, 1.0 / float(n)))
        off += r

    rows = x2.shape[0]
    block_rows = min(_MAX_BLOCK_ROWS, rows)
    nb = -(-rows // block_rows)
    num_cores = 2 if nb >= 2 else 1
    return _weighted_sse_call(x2, y2, segments=tuple(segments),
                              block_rows=block_rows, num_cores=num_cores)


def mse_pallas(x, y):
    """nn.MSELoss() (reduction='mean') via the Pallas TPU kernel."""
    return _grouped_mse((_prep_pair(x, y),))


class DistillLossPallas:
    """JAX/Pallas port of DistillLoss (forward semantics only)."""

    def __init__(self, distill_keys, task_loss=None, alpha=0.5, beta=0.5):
        self.distill_keys = distill_keys
        self.task_loss = task_loss
        self.alpha, self.beta = alpha, beta

    def __call__(self, outputs, targets):
        small, big = [], []
        for k in self.distill_keys:
            part = _prep_pair(outputs[k], targets[k])
            (small if part[0].shape[0] <= _FUSE_MAX_ROWS else big).append(part)

        loss = jnp.float32(0.0)
        if small:                       # one fused call for all small keys
            loss = loss + _grouped_mse(tuple(small))
        for part in big:                # dedicated call per large key
            loss = loss + _grouped_mse((part,))

        if self.task_loss is not None:
            loss = self.alpha * loss + self.beta * self.task_loss(outputs, targets)
        return loss


if __name__ == "__main__":
    key = jax.random.PRNGKey(0)
    k1, k2, k3, k4, k5, k6 = jax.random.split(key, 6)

    # Small shapes consistent with a distillation setup:
    # a feature map (NCHW) and a logits tensor per key.
    outputs = {
        "feat":   jax.random.normal(k1, (2, 4, 16, 16), dtype=jnp.float32),
        "logits": jax.random.normal(k2, (2, 32),        dtype=jnp.float32),
    }
    targets = {
        "feat":   jax.random.normal(k3, (2, 4, 16, 16), dtype=jnp.float32),
        "logits": jax.random.normal(k4, (2, 32),        dtype=jnp.float32),
    }

    # Optional task loss: also an MSE on "logits" through the same kernel,
    # exercising the alpha/beta mixing path.
    def task_loss(outs, tgts):
        return mse_pallas(outs["logits"], tgts["logits"])

    distill = DistillLossPallas(distill_keys=["feat", "logits"])
    distill_t = DistillLossPallas(distill_keys=["feat", "logits"],
                                  task_loss=task_loss, alpha=0.5, beta=0.5)

    loss_no_task = jax.jit(lambda o, t: distill(o, t))(outputs, targets)
    loss_task = jax.jit(lambda o, t: distill_t(o, t))(outputs, targets)
    jax.block_until_ready((loss_no_task, loss_task))

    # Pure-JAX reference.
    def ref_mse(a, b):
        return jnp.mean((a.astype(jnp.float32) - b.astype(jnp.float32)) ** 2)

    ref_no_task = ref_mse(outputs["feat"], targets["feat"]) + ref_mse(
        outputs["logits"], targets["logits"]
    )
    ref_task = 0.5 * ref_no_task + 0.5 * ref_mse(outputs["logits"], targets["logits"])

    assert jnp.allclose(loss_no_task, ref_no_task, rtol=1e-5, atol=1e-6)
    assert jnp.allclose(loss_task, ref_task, rtol=1e-5, atol=1e-6)

    # Extra consistency check of the multi-block / 2-core / ragged-edge /
    # native-bf16 path (5000 rows -> 3 blocks of 2048, odd block count).
    xb = jax.random.normal(k5, (2, 8, 200, 200), dtype=jnp.float32).astype(jnp.bfloat16)
    yb = jax.random.normal(k6, (2, 8, 200, 200), dtype=jnp.float32).astype(jnp.bfloat16)
    big_loss = mse_pallas(xb, yb)
    jax.block_until_ready(big_loss)
    assert jnp.allclose(big_loss, ref_mse(xb, yb), rtol=1e-4, atol=1e-5)

    print("KERNEL_OK")
</pallas_src>

<mosaic_0001>
module attributes {stable_mosaic.version = 11 : i64} {
  func.func @kernel(%arg0: i32, %arg1: i32, %arg2: memref<24x128xf32, #tpu.memory_space<vmem>>, %arg3: memref<24x128xf32, #tpu.memory_space<vmem>>, %arg4: memref<1x1xf32, #tpu.memory_space<smem>>, %arg5: memref<24x128xf32, #tpu.memory_space<vmem>>) attributes {dimension_semantics = [#tpu.dimension_semantics<parallel>, #tpu.dimension_semantics<arbitrary>], iteration_bounds = array<i64: 1, 1>, scalar_prefetch = 0 : i64, scratch_operands = 1 : i64, tpu.core_type = #tpu.core_type<tc>, window_params = [{transform_indices = @transform_0, window_bounds = array<i64: 24, 128>}, {transform_indices = @transform_1, window_bounds = array<i64: 24, 128>}, {transform_indices = @transform_2, window_bounds = array<i64: 1, 1>}]} {
    %c0_i32 = arith.constant 0 : i32
    %0 = arith.cmpi eq, %arg1, %c0_i32 : i32
    %1 = arith.extui %0 : i1 to i32
    %c0_i32_0 = arith.constant 0 : i32
    %2 = arith.cmpi ne, %1, %c0_i32_0 : i32
    scf.if %2 {
      %cst_17 = arith.constant 0.000000e+00 : f32
      %42 = vector.broadcast %cst_17 : f32 to vector<24x128xf32>
      %c0_18 = arith.constant 0 : index
      %c0_19 = arith.constant 0 : index
      %43 = vector.load %arg5[%c0_18, %c0_19] : memref<24x128xf32, #tpu.memory_space<vmem>>, vector<24x128xf32>
      tpu.vector_store %arg5[%c0_18, %c0_19], %42 {strides = array<i32>} : memref<24x128xf32, #tpu.memory_space<vmem>>, vector<24x128xf32>,
    } else {
    }
    %c0 = arith.constant 0 : index
    %c0_1 = arith.constant 0 : index
    %3 = vector.load %arg2[%c0, %c0_1] : memref<24x128xf32, #tpu.memory_space<vmem>>, vector<24x128xf32>
    %c0_2 = arith.constant 0 : index
    %c0_3 = arith.constant 0 : index
    %4 = vector.load %arg3[%c0_2, %c0_3] : memref<24x128xf32, #tpu.memory_space<vmem>>, vector<24x128xf32>
    %5 = arith.subf %3, %4 : vector<24x128xf32>
    %6 = arith.mulf %5, %5 : vector<24x128xf32>
    %c1_i32 = arith.constant 1 : i32
    %7 = arith.muli %arg0, %c1_i32 : i32
    %8 = arith.addi %7, %arg1 : i32
    %c24_i32 = arith.constant 24 : i32
    %9 = arith.muli %8, %c24_i32 : i32
    %10 = tpu.iota {dimensions = array<i32: 0>} : vector<24x1xi32>
    %11 = vector.broadcast %9 : i32 to vector<24x1xi32>
    %12 = arith.addi %11, %10 : vector<24x1xi32>
    %cst = arith.constant 0.000000e+00 : f32
    %13 = vector.broadcast %cst : f32 to vector<24x1xf32>
    %c0_i32_4 = arith.constant 0 : i32
    %14 = vector.broadcast %c0_i32_4 : i32 to vector<24x1xi32>
    %15 = arith.cmpi sge, %12, %14 : vector<24x1xi32>
    %c16_i32 = arith.constant 16 : i32
    %16 = vector.broadcast %c16_i32 : i32 to vector<24x1xi32>
    %17 = arith.cmpi slt, %12, %16 : vector<24x1xi32>
    %18 = arith.andi %15, %17 : vector<24x1xi1>
    %cst_5 = arith.constant 4.8828125E-4 : f32
    %19 = vector.broadcast %cst_5 : f32 to vector<24x1xf32>
    %20 = arith.select %18, %19, %13 : vector<24x1xi1>, vector<24x1xf32>
    %c16_i32_6 = arith.constant 16 : i32
    %21 = vector.broadcast %c16_i32_6 : i32 to vector<24x1xi32>
    %22 = arith.cmpi sge, %12, %21 : vector<24x1xi32>
    %c24_i32_7 = arith.constant 24 : i32
    %23 = vector.broadcast %c24_i32_7 : i32 to vector<24x1xi32>
    %24 = arith.cmpi slt, %12, %23 : vector<24x1xi32>
    %25 = arith.andi %22, %24 : vector<24x1xi1>
    %cst_8 = arith.constant 1.562500e-02 : f32
    %26 = vector.broadcast %cst_8 : f32 to vector<24x1xf32>
    %27 = arith.select %25, %26, %20 : vector<24x1xi1>, vector<24x1xf32>
    %c0_9 = arith.constant 0 : index
    %c0_10 = arith.constant 0 : index
    %28 = vector.load %arg5[%c0_9, %c0_10] : memref<24x128xf32, #tpu.memory_space<vmem>>, vector<24x128xf32>
    %c24_i32_11 = arith.constant 24 : i32
    %29 = vector.broadcast %c24_i32_11 : i32 to vector<24x1xi32>
    %30 = arith.cmpi slt, %12, %29 : vector<24x1xi32>
    %31 = vector.broadcast %27 : vector<24x1xf32> to vector<24x128xf32>
    %32 = arith.mulf %31, %6 : vector<24x128xf32>
    %cst_12 = arith.constant 0.000000e+00 : f32
    %33 = vector.shape_cast %30 : vector<24x1xi1> to vector<24x1xi1>
    %34 = vector.broadcast %33 : vector<24x1xi1> to vector<24x128xi1>
    %35 = vector.broadcast %cst_12 : f32 to vector<24x128xf32>
    %36 = arith.select %34, %32, %35 : vector<24x128xi1>, vector<24x128xf32>
    %37 = arith.addf %28, %36 : vector<24x128xf32>
    %c0_13 = arith.constant 0 : index
    %c0_14 = arith.constant 0 : index
    %38 = vector.load %arg5[%c0_13, %c0_14] : memref<24x128xf32, #tpu.memory_space<vmem>>, vector<24x128xf32>
    tpu.vector_store %arg5[%c0_13, %c0_14], %37 {strides = array<i32>} : memref<24x128xf32, #tpu.memory_space<vmem>>, vector<24x128xf32>,
    %c0_i32_15 = arith.constant 0 : i32
    %39 = arith.cmpi eq, %arg1, %c0_i32_15 : i32
    %40 = arith.extui %39 : i1 to i32
    %c0_i32_16 = arith.constant 0 : i32
    %41 = arith.cmpi ne, %40, %c0_i32_16 : i32
    scf.if %41 {
      %c0_17 = arith.constant 0 : index
      %c0_18 = arith.constant 0 : index
      %42 = vector.load %arg5[%c0_17, %c0_18] : memref<24x128xf32, #tpu.memory_space<vmem>>, vector<24x128xf32>
      %43 = vector.shape_cast %42 : vector<24x128xf32> to vector<1x24x128xf32>
      %cst_19 = arith.constant dense<0.000000e+00> : vector<1xf32>
      %44 = vector.multi_reduction <add>, %43, %cst_19 [1, 2] : vector<1x24x128xf32> to vector<1xf32>
      %45 = vector.shape_cast %44 : vector<1xf32> to vector<1x1x1xf32>
      %46 = vector.extract %45[0, 0, 0] : f32 from vector<1x1x1xf32>
      %c0_20 = arith.constant 0 : index
      %c0_21 = arith.constant 0 : index
      %47 = memref.load %arg4[%c0_20, %c0_21] : memref<1x1xf32, #tpu.memory_space<smem>>
      memref.store %46, %arg4[%c0_20, %c0_21] : memref<1x1xf32, #tpu.memory_space<smem>>
    } else {
    }
    return
  }
  func.func @transform_0(%arg0: i32, %arg1: i32) -> (i32, i32) {
    %c1_i32 = arith.constant 1 : i32
    %0 = arith.muli %arg0, %c1_i32 : i32
    %1 = arith.addi %0, %arg1 : i32
    %c0_i32 = arith.constant 0 : i32
    %2 = arith.minsi %1, %c0_i32 : i32
    %c0_i32_0 = arith.constant 0 : i32
    %c0_i32_1 = arith.constant 0 : i32
    return %2, %c0_i32_0 : i32, i32
  }
  func.func @transform_1(%arg0: i32, %arg1: i32) -> (i32, i32) {
    %c1_i32 = arith.constant 1 : i32
    %0 = arith.muli %arg0, %c1_i32 : i32
    %1 = arith.addi %0, %arg1 : i32
    %c0_i32 = arith.constant 0 : i32
    %2 = arith.minsi %1, %c0_i32 : i32
    %c0_i32_0 = arith.constant 0 : i32
    %c0_i32_1 = arith.constant 0 : i32
    return %2, %c0_i32_0 : i32, i32
  }
  func.func @transform_2(%arg0: i32, %arg1: i32) -> (i32, i32) {
    %c0_i32 = arith.constant 0 : i32
    %c0_i32_0 = arith.constant 0 : i32
    return %arg0, %c0_i32 : i32, i32
  }
}

</mosaic_0001>

<bundles_post_ra>
// kernel: _weighted_sse_call.1
= control target key start
LH: loop header
LB: loop body
LE: loop exit
PB: predicated region body
PF: predicated region fallthrough
CT: control target
= control target key end

     0   :  { %7 = vsyncpa [#allocation4], 0  ;;  %s295_s0 = inlined_call_operand.hbm [shape: f32[24,128], index: 0, kind: input, shape index: {}]   ;;  %s296_s1 = inlined_call_operand.hbm [shape: f32[24,128], index: 1, kind: input, shape index: {}]   ;;  %s297_s2 = inlined_call_operand.hbm [shape: f32[1,1], index: 2, kind: output, shape index: {}]  }
   0x1   :  { %8 = vsyncpa [#allocation7], 0 }
   0x2   :  { %9 = vsyncpa [#allocation5], 0  ;;  %s239_s9 = smov [#allocation3]   ;;  %s179_s13 = scalar_lea.hbm %s295_s0, 384 }
   0x3   :  { %s21_s10 = sshll.u32 %s239_s9, 4  ;;  %p180_p0 = scmp.ne.s32.totalorder %s295_s0, %s179_s13  ;;  %s22_s10 = int_to_ptr.vmem [resolvable:$true] %s21_s10 }
   0x4   :  { %p183_p1 = scmp.lt.u32.totalorder %s179_s13, %s295_s0 }
   0x6   :  { %p185_p2 = pnand %p183_p1, %p180_p0 }
   0x8   :  { %188 = shalt.err (!%p185_p2)
}
   0x9   :  { %s189_s18 = scalar_lea.vmem %s22_s10, 384  ;;  %p194_p4 = scmp.lt.s32.totalorder %s22_s10, %s22_s10 }
   0xa   :  { %p190_p3 = scmp.ne.s32.totalorder %s22_s10, %s189_s18  ;;  %p195_p5 = scmp.lt.s32.totalorder %s189_s18, %s189_s18 }
   0xc   :  { %p196_p6 = por %p195_p5, %p194_p4 }
   0xe   :  { %p197_p7 = pnand %p196_p6, %p190_p3 }
  0x10   :  { %200 = shalt.err (!%p197_p7)
}
  0x11   :  { %s240_s19 = smov 128   ;;  %s241_s20 = smov 8  }
  0x12   :  { %27 = dma.hbm_to_vmem [thread:$0]  %s295_s0, 384, %s22_s10, [#allocation4], %s240_s19, %s240_s19, %s241_s20  }
  0x13   :  { %s242_s23 = smov [#allocation6]   ;;  %s201_s27 = scalar_lea.hbm %s296_s1, 384 }
  0x14   :  { %s39_s24 = sshll.u32 %s242_s23, 4  ;;  %p202_p8 = scmp.ne.s32.totalorder %s296_s1, %s201_s27  ;;  %s40_s24 = int_to_ptr.vmem [resolvable:$true] %s39_s24 }
  0x15   :  { %p205_p9 = scmp.lt.u32.totalorder %s201_s27, %s296_s1 }
  0x17   :  { %p207_p10 = pnand %p205_p9, %p202_p8 }
  0x19   :  { %210 = shalt.err (!%p207_p10)
}
  0x1a   :  { %s211_s4 = scalar_lea.vmem %s40_s24, 384  ;;  %p216_p12 = scmp.lt.s32.totalorder %s40_s24, %s40_s24 }
  0x1b   :  { %p212_p11 = scmp.ne.s32.totalorder %s40_s24, %s211_s4  ;;  %p217_p13 = scmp.lt.s32.totalorder %s211_s4, %s211_s4 }
  0x1d   :  { %p218_p0 = por %p217_p13, %p216_p12 }
  0x1f   :  { %p219_p1 = pnand %p218_p0, %p212_p11 }
  0x21   :  { %222 = shalt.err (!%p219_p1)
}
  0x22   :  { %45 = dma.hbm_to_vmem [thread:$0]  %s296_s1, 384, %s40_s24, [#allocation7], %s240_s19, %s240_s19, %s241_s20  }
  0x23   :  { %233 = dma.done.wait [#allocation4], 384  }
  0x24   :  { %234 = vsyncadd [#allocation4], 4294966912 }
  0x25   :  { %235 = dma.done.wait [#allocation7], 384  }
  0x26   :  { %236 = vsyncadd [#allocation7], 4294966912  ;;  %v67_v0 = vld [vmem:[#allocation3] sm:$0xff]  ;;  %v68_v1 = vld [vmem:[#allocation3 + $0x8] sm:$0xff]  ;;  %s223_s8 = scalar_lea.hbm %s297_s2, 16 }
  0x27   :  { %v69_v2 = vld [vmem:[#allocation3 + $0x10] sm:$0xff]  ;;  %v70_v3 = vld [vmem:[#allocation6] sm:$0xff]  ;;  %v71_v4 = vld [vmem:[#allocation6 + $0x8] sm:$0xff]  ;;  %p224_p2 = scmp.ne.s32.totalorder %s297_s2, %s223_s8  ;;  %p227_p3 = scmp.lt.u32.totalorder %s223_s8, %s297_s2 }
  0x28   :  { %v72_v5 = vld [vmem:[#allocation6 + $0x10] sm:$0xff]  ;;  %v73_v6 = vsub.f32 %v67_v0, %v70_v3  ;;  %v74_v7 = vsub.f32 %v68_v1, %v71_v4 }
  0x29   :  { %v75_v8 = vsub.f32 %v69_v2, %v72_v5  ;;  %p229_p4 = pnand %p227_p3, %p224_p2 }
  0x2a   :  { %v76_v9 = vmul.f32 %v73_v6, %v73_v6  ;;  %v77_v10 = vmul.f32 %v74_v7, %v74_v7 }
  0x2b   :  { %v78_v11 = vmul.f32 %v75_v8, %v75_v8 }
  0x2c   :  { %v116_v12 = vmul.f32 0.00048828125, %v76_v9  ;;  %v117_v13 = vmul.f32 0.00048828125, %v77_v10 }
  0x2d   :  { %v118_v14 = vmul.f32 0.015625, %v78_v11 }
  0x2e   :  { %v140_v15 = vadd.f32 %v117_v13, %v116_v12 }
  0x30   :  { %v141_v16 = vadd.f32 %v140_v15, %v118_v14 }
  0x32   :  { %142 = vadd.xlane.f32.xlu0 %v141_v16 }
  0xbf   :  { %v143_v17 = vpop.xlane.xlu0 %142 }
  0xc0   :  { %v144_v18 = vrot.slane %v143_v17, 4 }
  0xc2   :  { %v145_v19 = vadd.f32 %v144_v18, %v143_v17 }
  0xc4   :  { %v146_v20 = vrot.slane %v145_v19, 2 }
  0xc6   :  { %v147_v21 = vadd.f32 %v146_v20, %v145_v19 }
  0xc8   :  { %v148_v22 = vrot.slane %v147_v21, 1 }
  0xca   :  { %v149_v23 = vadd.f32 %v148_v22, %v147_v21 }
  0xcc   :  { %172 = vpush %v149_v23 }
  0xfd   :  { %s173_s1 = spop %172 }
  0xfe   :  { %152 = sst [smem:[#allocation8]] %s173_s1 }
  0xff   :  { %232 = shalt.err (!%p229_p4)
}
 0x100   :  { %s243_s13 = smov [#allocation8]  }
 0x101   :  { %160 = dma.smem_to_hbm %s243_s13, 16, %s297_s2, [#allocation5]  }
 0x102   :  { %237 = dma.done.wait [#allocation5], 16  }
 0x103   :  { %238 = vsyncadd [#allocation5], 4294967280 }
 0x104   :  { %164 = sfence }
 0x105   :  { %165 = vsyncpa [#allocation4], 1 }
 0x106   :  { %166 = vsyncpa [#allocation7], 1 }
 0x107   :  { %167 = vsyncpa [#allocation5], 1 }

</bundles_post_ra>
